<compile_context>
chip_gen: v6e
topology: v6e:2x2x1
jax: 0.10.0
libtpu: 0.0.40
codegen_flags: <defaults>
</compile_context>

<pallas_src>
import math

import jax
import jax.numpy as jnp
from jax.experimental import pallas as pl
from jax.experimental.pallas import tpu as pltpu


_VMEM_LIMIT = 48 * 1024 * 1024


def _tile(dim, desired):
    """Pick a tile size: `desired` if it evenly divides `dim`, else the full dim."""
    if dim <= desired or dim % desired != 0:
        return dim
    return desired


# --------------------------- tiled matmul + bias ---------------------------- #

def _mm_bias_kernel(x_ref, w_ref, b_ref, o_ref, acc_ref):
    @pl.when(pl.program_id(2) == 0)
    def _():
        acc_ref[...] = jnp.zeros_like(acc_ref)

    acc_ref[...] += jnp.dot(
        x_ref[...].astype(jnp.bfloat16),
        w_ref[...].astype(jnp.bfloat16),
        preferred_element_type=jnp.float32,
    )

    @pl.when(pl.program_id(2) == pl.num_programs(2) - 1)
    def _():
        o_ref[...] = (acc_ref[...] + b_ref[...]).astype(o_ref.dtype)


def matmul_bias(x, w, b, *, tm=256, tn=256, tk=512, out_dtype=jnp.float32):
    """x: [M, K] (f32), w: [K, N] (bf16), b: [N] (f32) -> [M, N] (out_dtype)."""
    M, K = x.shape
    N = w.shape[1]
    tm, tn, tk = _tile(M, tm), _tile(N, tn), _tile(K, tk)
    grid = (M // tm, N // tn, K // tk)
    return pl.pallas_call(
        _mm_bias_kernel,
        grid=grid,
        in_specs=[
            pl.BlockSpec((tm, tk), lambda i, j, k: (i, k)),
            pl.BlockSpec((tk, tn), lambda i, j, k: (k, j)),
            pl.BlockSpec((1, tn), lambda i, j, k: (0, j)),
        ],
        out_specs=pl.BlockSpec((tm, tn), lambda i, j, k: (i, j)),
        out_shape=jax.ShapeDtypeStruct((M, N), out_dtype),
        scratch_shapes=[pltpu.VMEM((tm, tn), jnp.float32)],
        compiler_params=pltpu.CompilerParams(
            dimension_semantics=("parallel", "parallel", "arbitrary"),
            vmem_limit_bytes=_VMEM_LIMIT,
        ),
    )(x, w, b.reshape(1, N))


# ------------------------------ attention core ------------------------------ #

def _make_attention_kernel(nh, hd, scale):
    def kern(q_ref, k_ref, v_ref, m_ref, o_ref, p_ref):
        m = m_ref[0]                                      # (qlen, klen) f32
        for h in range(nh):                               # static unroll over heads
            lo, hi = h * hd, (h + 1) * hd
            qh = q_ref[0, :, lo:hi]                       # (qlen, hd) bf16
            kh = k_ref[0, :, lo:hi]                       # (klen, hd) bf16
            vh = v_ref[0, :, lo:hi]                       # (klen, hd) bf16
            s = jax.lax.dot_general(
                qh, kh, (((1,), (1,)), ((), ())),
                preferred_element_type=jnp.float32,
            ) * scale                                     # (qlen, klen) f32
            s = jnp.where(m > 0.5, jnp.float32(-1e30), s)
            mx = jnp.max(s, axis=-1, keepdims=True)
            e = jnp.exp(s - mx)
            l = jnp.sum(e, axis=-1, keepdims=True)
            p = e * pl.reciprocal(l, approx=True)         # EUP reciprocal
            p_ref[0, h] = p
            o_ref[0, :, lo:hi] = jnp.dot(
                p.astype(jnp.bfloat16), vh,
                preferred_element_type=jnp.float32,
            ).astype(o_ref.dtype)
    return kern


def attention_core(q, k, v, mask, n_heads, head_dim):
    """q/k/v: [B, L, nh*hd] (bf16, lane-dense), mask: [B, qlen, klen] (1 = blocked).

    Returns (out [B, qlen, nh*hd] bf16, prob [B, nh, qlen, klen] f32).
    One grid step per batch element, all heads processed inside the step.
    """
    B, qlen, D = q.shape
    klen = k.shape[1]
    scale = 1.0 / math.sqrt(head_dim)
    kern = _make_attention_kernel(n_heads, head_dim, scale)
    out, prob = pl.pallas_call(
        kern,
        grid=(B,),
        in_specs=[
            pl.BlockSpec((1, qlen, D), lambda b: (b, 0, 0)),
            pl.BlockSpec((1, klen, D), lambda b: (b, 0, 0)),
            pl.BlockSpec((1, klen, D), lambda b: (b, 0, 0)),
            pl.BlockSpec((1, qlen, klen), lambda b: (b, 0, 0)),
        ],
        out_specs=[
            pl.BlockSpec((1, qlen, D), lambda b: (b, 0, 0)),
            pl.BlockSpec((1, n_heads, qlen, klen), lambda b: (b, 0, 0, 0)),
        ],
        out_shape=[
            jax.ShapeDtypeStruct((B, qlen, D), jnp.bfloat16),
            # NOTE: attention probabilities kept f32 to match PyTorch semantics;
            # drop or emit bf16 if unused downstream (v5e store-bandwidth win).
            jax.ShapeDtypeStruct((B, n_heads, qlen, klen), jnp.float32),
        ],
        compiler_params=pltpu.CompilerParams(
            dimension_semantics=("parallel",),
            vmem_limit_bytes=_VMEM_LIMIT,
        ),
    )(q, k, v, mask)
    return out, prob


# -------------------- fused o-proj + residual + LayerNorm ------------------- #

def _oproj_add_ln_kernel(a_ref, w_ref, b_ref, r_ref, g_ref, be_ref, o_ref):
    y = jnp.dot(a_ref[...], w_ref[...], preferred_element_type=jnp.float32) + b_ref[...]
    h = y + r_ref[...]
    mu = jnp.mean(h, axis=-1, keepdims=True)
    var = jnp.mean((h - mu) ** 2, axis=-1, keepdims=True)
    o_ref[...] = ((h - mu) * jax.lax.rsqrt(var + 1e-5) * g_ref[...] + be_ref[...]
                  ).astype(o_ref.dtype)


def oproj_add_layernorm(att, w, b, res, gamma, beta, *, tm=256):
    """LayerNorm(res + att @ w + b).  att: [M, D] bf16, res: [M, H] f32 -> [M, H] f32."""
    M, D = att.shape
    H = w.shape[1]
    tm = _tile(M, tm)
    grid = (M // tm,)
    return pl.pallas_call(
        _oproj_add_ln_kernel,
        grid=grid,
        in_specs=[
            pl.BlockSpec((tm, D), lambda i: (i, 0)),
            pl.BlockSpec((D, H), lambda i: (0, 0)),    # weight resident, no re-DMA
            pl.BlockSpec((1, H), lambda i: (0, 0)),
            pl.BlockSpec((tm, H), lambda i: (i, 0)),
            pl.BlockSpec((1, H), lambda i: (0, 0)),
            pl.BlockSpec((1, H), lambda i: (0, 0)),
        ],
        out_specs=pl.BlockSpec((tm, H), lambda i: (i, 0)),
        out_shape=jax.ShapeDtypeStruct((M, H), jnp.float32),
        compiler_params=pltpu.CompilerParams(
            dimension_semantics=("parallel",),
            vmem_limit_bytes=_VMEM_LIMIT,
        ),
    )(att, w, b.reshape(1, H), res, gamma.reshape(1, H), beta.reshape(1, H))


# ----------------------- fused residual feed-forward ------------------------ #

def _ffn_kernel(x_ref, w1_ref, b1_ref, w2_ref, b2_ref, g_ref, be_ref, o_ref):
    x = x_ref[...]
    h = jnp.maximum(
        jnp.dot(x.astype(jnp.bfloat16), w1_ref[...],
                preferred_element_type=jnp.float32) + b1_ref[...],
        0.0,
    )
    y = jnp.dot(h.astype(jnp.bfloat16), w2_ref[...],
                preferred_element_type=jnp.float32) + b2_ref[...]
    z = x + y
    mu = jnp.mean(z, axis=-1, keepdims=True)
    var = jnp.mean((z - mu) ** 2, axis=-1, keepdims=True)
    o_ref[...] = ((z - mu) * jax.lax.rsqrt(var + 1e-5) * g_ref[...] + be_ref[...]
                  ).astype(o_ref.dtype)


def residual_ff(x, p, *, tm=256):
    """Fused post-LN ResidualFF: LN(x + relu(x@W1+b1)@W2+b2).  x: [M, H] f32."""
    M, H = x.shape
    P = p["w1"].shape[1]
    tm = _tile(M, tm)
    grid = (M // tm,)
    return pl.pallas_call(
        _ffn_kernel,
        grid=grid,
        in_specs=[
            pl.BlockSpec((tm, H), lambda i: (i, 0)),
            pl.BlockSpec((H, P), lambda i: (0, 0)),    # weights resident, no re-DMA
            pl.BlockSpec((1, P), lambda i: (0, 0)),
            pl.BlockSpec((P, H), lambda i: (0, 0)),
            pl.BlockSpec((1, H), lambda i: (0, 0)),
            pl.BlockSpec((1, H), lambda i: (0, 0)),
            pl.BlockSpec((1, H), lambda i: (0, 0)),
        ],
        out_specs=pl.BlockSpec((tm, H), lambda i: (i, 0)),
        out_shape=jax.ShapeDtypeStruct((M, H), jnp.float32),
        compiler_params=pltpu.CompilerParams(
            dimension_semantics=("parallel",),
            vmem_limit_bytes=_VMEM_LIMIT,
        ),
    )(
        x, p["w1"], p["b1"].reshape(1, P), p["w2"], p["b2"].reshape(1, H),
        p["ln_g"].reshape(1, H), p["ln_b"].reshape(1, H),
    )


# ------------------------------ BaseBlock forward ---------------------------- #

def base_block_forward(x, mask, params, n_heads, head_dim):
    """Encoder-style BaseBlock forward (post-LN, eval).

    x: [B, L, H] f32, mask: [B, L, L] f32 (1 = blocked).
    Returns (out [B, L, H] f32, new_mem [B, L, H] f32, att_prob [B, nh, L, L] f32).
    """
    B, L, H = x.shape
    D = n_heads * head_dim
    M = B * L
    x2 = x.reshape(M, H)

    # Fused Q/K/V projection: single pass over the activation.
    qkv = matmul_bias(x2, params["wqkv"], params["bqkv"], out_dtype=jnp.bfloat16)
    q = qkv[:, :D].reshape(B, L, D)
    k = qkv[:, D:2 * D].reshape(B, L, D)
    v = qkv[:, 2 * D:].reshape(B, L, D)

    att, prob = attention_core(q, k, v, mask, n_heads, head_dim)

    # Output projection fused with residual add + LayerNorm (post-LN).
    att_out = oproj_add_layernorm(
        att.reshape(M, D), params["wo"], params["bo"],
        x2, params["att_ln_g"], params["att_ln_b"],
    )

    # Fused residual feed-forward (post-LN).
    out = residual_ff(att_out, params["ff"])

    # new_mem for self-attention with mem=None is just the kv input (= x).
    return out.reshape(B, L, H), x, prob


# ------------------------------ parameter init ------------------------------- #

def init_block_params(key, hidden_dim, projection_dim, n_heads, head_dim):
    H, P, D = hidden_dim, projection_dim, n_heads * head_dim
    ks = jax.random.split(key, 6)

    def dense(k, din, dout):
        return (jax.random.normal(k, (din, dout), jnp.float32) * 0.05,
                jnp.zeros((dout,), jnp.float32))

    wq, bq = dense(ks[0], H, D)
    wk, bk = dense(ks[1], H, D)
    wv, bv = dense(ks[2], H, D)
    wo, bo = dense(ks[3], D, H)
    w1, b1 = dense(ks[4], H, P)
    w2, b2 = dense(ks[5], P, H)

    return {
        # bf16 weights: native MXU path, half the HBM/VMEM footprint.
        "wqkv": jnp.concatenate([wq, wk, wv], axis=1).astype(jnp.bfloat16),
        "bqkv": jnp.concatenate([bq, bk, bv]),
        "wo": wo.astype(jnp.bfloat16),
        "bo": bo,
        "att_ln_g": jnp.ones((H,), jnp.float32),
        "att_ln_b": jnp.zeros((H,), jnp.float32),
        "ff": {
            "w1": w1.astype(jnp.bfloat16), "b1": b1,
            "w2": w2.astype(jnp.bfloat16), "b2": b2,
            "ln_g": jnp.ones((H,), jnp.float32),
            "ln_b": jnp.zeros((H,), jnp.float32),
        },
    }


# ----------------------------------- main ------------------------------------ #

if __name__ == "__main__":
    B, L, H, P = 2, 8, 32, 64
    n_heads, head_dim = 2, 16

    key = jax.random.PRNGKey(0)
    kp, kx = jax.random.split(key)
    params = init_block_params(kp, H, P, n_heads, head_dim)
    x = jax.random.normal(kx, (B, L, H), jnp.float32)

    # Padding mask from lengths (1 = blocked), broadcast to [B, L, L] (bidirectional).
    lengths = jnp.array([8, 5], jnp.int32)
    pad = (jnp.arange(L)[None, :] >= lengths[:, None]).astype(jnp.float32)
    mask = jnp.broadcast_to(pad[:, None, :], (B, L, L))

    out, new_mem, att_prob = base_block_forward(x, mask, params, n_heads, head_dim)
    jax.block_until_ready(out)
    jax.block_until_ready(att_prob)

    assert out.shape == (B, L, H)
    assert new_mem.shape == (B, L, H)
    assert att_prob.shape == (B, n_heads, L, L)
    assert bool(jnp.all(jnp.isfinite(out)))
    print("KERNEL_OK")
</pallas_src>

<mosaic_0001>
module attributes {stable_mosaic.version = 11 : i64} {
  func.func @_mm_bias_kernel(%arg0: i32, %arg1: i32, %arg2: i32, %arg3: memref<16x32xf32, #tpu.memory_space<vmem>>, %arg4: memref<32x96xbf16, #tpu.memory_space<vmem>>, %arg5: memref<1x96xf32, #tpu.memory_space<vmem>>, %arg6: memref<16x96xbf16, #tpu.memory_space<vmem>>, %arg7: memref<16x96xf32, #tpu.memory_space<vmem>>) attributes {dimension_semantics = [#tpu.dimension_semantics<parallel>, #tpu.dimension_semantics<parallel>, #tpu.dimension_semantics<arbitrary>], iteration_bounds = array<i64: 1, 1, 1>, scalar_prefetch = 0 : i64, scratch_operands = 1 : i64, tpu.core_type = #tpu.core_type<tc>, window_params = [{transform_indices = @transform_0, window_bounds = array<i64: 16, 32>}, {transform_indices = @transform_1, window_bounds = array<i64: 32, 96>}, {transform_indices = @transform_2, window_bounds = array<i64: 1, 96>}, {transform_indices = @transform_3, window_bounds = array<i64: 16, 96>}]} {
    %c0_i32 = arith.constant 0 : i32
    %0 = arith.cmpi eq, %arg2, %c0_i32 : i32
    %1 = arith.extui %0 : i1 to i32
    %c0_i32_0 = arith.constant 0 : i32
    %2 = arith.cmpi ne, %1, %c0_i32_0 : i32
    scf.if %2 {
      %cst_10 = arith.constant 0.000000e+00 : f32
      %13 = vector.broadcast %cst_10 : f32 to vector<16x96xf32>
      %c0_11 = arith.constant 0 : index
      %c0_12 = arith.constant 0 : index
      %14 = vector.load %arg7[%c0_11, %c0_12] : memref<16x96xf32, #tpu.memory_space<vmem>>, vector<16x96xf32>
      tpu.vector_store %arg7[%c0_11, %c0_12], %13 {strides = array<i32>} : memref<16x96xf32, #tpu.memory_space<vmem>>, vector<16x96xf32>,
    } else {
    }
    %c0 = arith.constant 0 : index
    %c0_1 = arith.constant 0 : index
    %3 = vector.load %arg7[%c0, %c0_1] : memref<16x96xf32, #tpu.memory_space<vmem>>, vector<16x96xf32>
    %c0_2 = arith.constant 0 : index
    %c0_3 = arith.constant 0 : index
    %4 = vector.load %arg3[%c0_2, %c0_3] : memref<16x32xf32, #tpu.memory_space<vmem>>, vector<16x32xf32>
    %5 = arith.truncf %4 : vector<16x32xf32> to vector<16x32xbf16>
    %c0_4 = arith.constant 0 : index
    %c0_5 = arith.constant 0 : index
    %6 = vector.load %arg4[%c0_4, %c0_5] : memref<32x96xbf16, #tpu.memory_space<vmem>>, vector<32x96xbf16>
    %cst = arith.constant dense<0.000000e+00> : vector<16x96xf32>
    %7 = tpu.matmul %5, %6, %cst {dimension_numbers = #tpu.dot_dimension_numbers<[1], [0], [0], [1], [0, 0, 1, 1], [], []>} : vector<16x32xbf16>, vector<32x96xbf16>, vector<16x96xf32> -> vector<16x96xf32>
    %8 = arith.addf %3, %7 : vector<16x96xf32>
    %c0_6 = arith.constant 0 : index
    %c0_7 = arith.constant 0 : index
    %9 = vector.load %arg7[%c0_6, %c0_7] : memref<16x96xf32, #tpu.memory_space<vmem>>, vector<16x96xf32>
    tpu.vector_store %arg7[%c0_6, %c0_7], %8 {strides = array<i32>} : memref<16x96xf32, #tpu.memory_space<vmem>>, vector<16x96xf32>,
    %c0_i32_8 = arith.constant 0 : i32
    %10 = arith.cmpi eq, %arg2, %c0_i32_8 : i32
    %11 = arith.extui %10 : i1 to i32
    %c0_i32_9 = arith.constant 0 : i32
    %12 = arith.cmpi ne, %11, %c0_i32_9 : i32
    scf.if %12 {
      %c0_10 = arith.constant 0 : index
      %c0_11 = arith.constant 0 : index
      %13 = vector.load %arg7[%c0_10, %c0_11] : memref<16x96xf32, #tpu.memory_space<vmem>>, vector<16x96xf32>
      %c0_12 = arith.constant 0 : index
      %c0_13 = arith.constant 0 : index
      %14 = vector.load %arg5[%c0_12, %c0_13] : memref<1x96xf32, #tpu.memory_space<vmem>>, vector<1x96xf32>
      %15 = vector.broadcast %14 : vector<1x96xf32> to vector<16x96xf32>
      %16 = arith.addf %13, %15 : vector<16x96xf32>
      %17 = arith.truncf %16 : vector<16x96xf32> to vector<16x96xbf16>
      %c0_14 = arith.constant 0 : index
      %c0_15 = arith.constant 0 : index
      %18 = vector.load %arg6[%c0_14, %c0_15] : memref<16x96xbf16, #tpu.memory_space<vmem>>, vector<16x96xbf16>
      tpu.vector_store %arg6[%c0_14, %c0_15], %17 {strides = array<i32>} : memref<16x96xbf16, #tpu.memory_space<vmem>>, vector<16x96xbf16>,
    } else {
    }
    return
  }
  func.func @transform_0(%arg0: i32, %arg1: i32, %arg2: i32) -> (i32, i32) {
    %c0_i32 = arith.constant 0 : i32
    return %arg0, %arg2 : i32, i32
  }
  func.func @transform_1(%arg0: i32, %arg1: i32, %arg2: i32) -> (i32, i32) {
    %c0_i32 = arith.constant 0 : i32
    return %arg2, %arg1 : i32, i32
  }
  func.func @transform_2(%arg0: i32, %arg1: i32, %arg2: i32) -> (i32, i32) {
    %c0_i32 = arith.constant 0 : i32
    %c0_i32_0 = arith.constant 0 : i32
    return %c0_i32, %arg1 : i32, i32
  }
  func.func @transform_3(%arg0: i32, %arg1: i32, %arg2: i32) -> (i32, i32) {
    %c0_i32 = arith.constant 0 : i32
    return %arg0, %arg1 : i32, i32
  }
}

</mosaic_0001>

<bundles_post_ra>
// kernel: tpu_custom_call.1
= control target key start
LH: loop header
LB: loop body
LE: loop exit
PB: predicated region body
PF: predicated region fallthrough
CT: control target
= control target key end

     0   :  { %8 = vsyncpa [#allocation4], 0  ;;  %s312_s0 = inlined_call_operand.hbm [shape: f32[16,32], index: 0, kind: input, shape index: {}]   ;;  %s313_s1 = inlined_call_operand.hbm [shape: bf16[32,96], index: 1, kind: input, shape index: {}]   ;;  %s314_s2 = inlined_call_operand.vmem [shape: f32[1,96], index: 2, kind: input, shape index: {}]   ;;  %s315_s3 = inlined_call_operand.hbm [shape: bf16[16,96], index: 3, kind: output, shape index: {}]  }
   0x1   :  { %9 = vsyncpa [#allocation7], 0 }
   0x2   :  { %10 = vsyncpa [#allocation5], 0  ;;  %s261_s12 = smov [#allocation3]  }
   0x3   :  { %s16_s13 = sshll.u32 %s261_s12, 4  ;;  %s17_s13 = int_to_ptr.vmem [resolvable:$true] %s16_s13 }
   0x4   :  { %s203_s14 = scalar_lea.vmem %s17_s13, 256  ;;  %p208_p1 = scmp.lt.s32.totalorder %s17_s13, %s17_s13 }
   0x5   :  { %p204_p0 = scmp.ne.s32.totalorder %s17_s13, %s203_s14  ;;  %p209_p2 = scmp.lt.s32.totalorder %s203_s14, %s203_s14 }
   0x7   :  { %p210_p3 = por %p209_p2, %p208_p1 }
   0x9   :  { %p211_p4 = pnand %p210_p3, %p204_p0 }
   0xb   :  { %214 = shalt.err (!%p211_p4)
}
   0xc   :  { %s262_s15 = smov 128   ;;  %s263_s16 = smov 8  }
   0xd   :  { %22 = dma.hbm_to_vmem [thread:$0]  %s312_s0, 256, %s17_s13, [#allocation4], %s262_s15, %s262_s15, %s263_s16  }
   0xe   :  { %s264_s19 = smov [#allocation6]  }
   0xf   :  { %s28_s20 = sshll.u32 %s264_s19, 4  ;;  %s29_s20 = int_to_ptr.vmem [resolvable:$true] %s28_s20 }
  0x10   :  { %s223_s21 = scalar_lea.vmem %s29_s20, 256  ;;  %p228_p6 = scmp.lt.s32.totalorder %s29_s20, %s29_s20 }
  0x11   :  { %p224_p5 = scmp.ne.s32.totalorder %s29_s20, %s223_s21  ;;  %p229_p7 = scmp.lt.s32.totalorder %s223_s21, %s223_s21 }
  0x13   :  { %p230_p8 = por %p229_p7, %p228_p6 }
  0x15   :  { %p231_p9 = pnand %p230_p8, %p224_p5 }
  0x17   :  { %234 = shalt.err (!%p231_p9)
}
  0x18   :  { %s265_s22 = smov 64   ;;  %s266_s23 = smov 4  }
  0x19   :  { %34 = dma.hbm_to_vmem [thread:$0]  %s313_s1, 256, %s29_s20, [#allocation7], %s265_s22, %s265_s22, %s266_s23  }
  0x1a   :  { %255 = dma.done.wait [#allocation4], 256  }
  0x1b   :  { %256 = vsyncadd [#allocation4], 4294967040 }
  0x1c   :  { %257 = dma.done.wait [#allocation7], 256  }
  0x1d   :  { %258 = vsyncadd [#allocation7], 4294967040  ;;  %vm48_vm0 = vcmask 785408   ;;  %v267_v0 = vmov 0.0   ;;  %vm268_vm1 = vmmov 0   ;;  %v193_v1 = vld [vmem:[#allocation6 + $0x8] sm:$0xff]  }
  0x1e   :  { %49 = vst.msk [vmem:[#allocation2] sm:$0xff] %vm48_vm0, %v267_v0  ;;  %50 = vst.msk [vmem:[#allocation2 + $0x8] sm:$0xff] %vm48_vm0, %v267_v0  ;;  %176 = vmatprep.subr.bf16.mxu0 %v267_v0  ;;  %180 = vmatprep.mubr.msk.bf16.mxu0 %vm268_vm1, %v267_v0  ;;  %v194_v2 = vld [vmem:[#allocation6] sm:$0xff]   ;;  %v53_v3 = vld [vmem:[#allocation3] sm:$0xff]  ;;  %vm72_vm2 = vcmask 261120   ;;  %vm144_vm3 = vcmask 781312  }
  0x1f   :  { %177 = vmatpush3.bf16.msra.mxu0 %v193_v1  ;;  %v54_v4 = vld [vmem:[#allocation3 + $0x8] sm:$0xff]  ;;  %v168_v14 = vld [vmem:[%s314_s2] ss:$0 sm:$0xff]  ;;  %s269_s26 = smov [#allocation8]  }
  0x20   :  { %178 = vmatprep.subr.bf16.mxu0 %v267_v0  ;;  %v55_v5 = vpack.c.bf16 %v54_v4, %v53_v3  ;;  %s152_s27 = sshll.u32 %s269_s26, 4  ;;  %s153_s27 = int_to_ptr.vmem [resolvable:$true] %s152_s27 }
  0x21   :  { %s235_s28 = scalar_lea.vmem %s153_s27, 128  ;;  %p240_p11 = scmp.lt.s32.totalorder %s153_s27, %s153_s27 }
  0x22   :  { %p236_p10 = scmp.ne.s32.totalorder %s153_s27, %s235_s28  ;;  %p241_p12 = scmp.lt.s32.totalorder %s235_s28, %s235_s28 }
  0x23   :  { %179 = vmatpush3.bf16.msra.mxu0 %v194_v2 }
  0x24   :  { %p242_p13 = por %p241_p12, %p240_p11 }
  0x25   :  { %v51_v6 = vld [vmem:[#allocation2] sm:$0xff]  ;;  %v52_v10 = vld [vmem:[#allocation2 + $0x8] sm:$0xff] }
  0x26   :  { %181 = vmatmul.mubr.msk.bf16.vlgmr.msra.gmra.mxu0 %vm72_vm2, %v55_v5  ;;  %p243_p0 = pnand %p242_p13, %p236_p10 }
  0xe6   :  { %v110_v7 = vpop.f32.mrf.mxu0 }
  0xe7   :  { %v117_v8 = vadd.f32 %v110_v7, %v51_v6 }
  0xe8   :  { %v182_v9 = vpop.f32.mrf.mxu0 }
  0xe9   :  { %120 = vst.msk [vmem:[#allocation2] sm:$0xff] %vm48_vm0, %v117_v8 }
  0xea   :  { %v113_v11 = vpop.f32.mrf.mxu0 }
  0xeb   :  { %v118_v12 = vadd.f32 %v113_v11, %v52_v10 }
  0xec   :  { %v183_v13 = vpop.f32.mrf.mxu0 }
  0xed   :  { %121 = vst.msk [vmem:[#allocation2 + $0x8] sm:$0xff] %vm48_vm0, %v118_v12 }
  0xf0   :  { %v125_v15 = vld [vmem:[#allocation2] sm:$0xff] }
  0xf1   :  { %v134_v16 = vadd.f32 %v168_v14, %v125_v15 }
  0xf3   :  { %v171_v17 = vpack.c.bf16 %v134_v16, %v134_v16 }
  0xf4   :  { %v126_v18 = vld [vmem:[#allocation2 + $0x8] sm:$0xff] }
  0xf5   :  { %v135_v19 = vadd.f32 %v168_v14, %v126_v18  ;;  %145 = vst.msk [vmem:[#allocation8] sm:$0xf] %vm144_vm3, %v171_v17 }
  0xf7   :  { %v172_v20 = vpack.c.bf16 %v135_v19, %v135_v19 }
  0xf9   :  { %146 = vst.msk [vmem:[#allocation8 + $0x4] sm:$0xf] %vm144_vm3, %v172_v20 }
  0xfa   :  { %246 = shalt.err (!%p243_p0)
}
  0xfb   :  { %158 = dma.vmem_to_hbm [thread:$0]  %s153_s27, 128, %s315_s3, [#allocation5], %s265_s22, %s265_s22, %s266_s23  }
  0xfc   :  { %259 = dma.done.wait [#allocation5], 128  }
  0xfd   :  { %260 = vsyncadd [#allocation5], 4294967168 }
  0xfe   :  { %162 = vsyncpa [#allocation4], 1 }
  0xff   :  { %163 = vsyncpa [#allocation7], 1 }
 0x100   :  { %164 = vsyncpa [#allocation5], 1 }

</bundles_post_ra>
